<compile_context>
chip_gen: v7x
topology: tpu7x:2x2x1
jax: 0.10.0
libtpu: 0.0.40
codegen_flags: <defaults>
</compile_context>

<pallas_src>
import functools

import jax
import jax.numpy as jnp
from jax.experimental import pallas as pl
from jax.experimental.pallas import tpu as pltpu


def _round_up(n, m):
    return ((n + m - 1) // m) * m


def _has_bf16_vpu():
    """True on chips with bf16 VPU/EUP (v6e / v7x); False on v5e and unknown."""
    try:
        kind = jax.devices()[0].device_kind.lower()
    except Exception:
        return False
    return ("v6" in kind) or ("v7" in kind) or ("7x" in kind)


def _choose_tile_b(B, tile_b):
    tb = max(8, min(_round_up(tile_b, 8), _round_up(B, 8)))
    # Keep both v7x TensorCores busy: ensure the parallel batch axis has at
    # least 2 grid steps whenever the batch is big enough to split.
    if pl.cdiv(B, tb) < 2 and B > 16:
        tb = max(8, _round_up(pl.cdiv(B, 2), 8))
    return tb


def _evalhead_kernel(x_ref, w1_ref, b1_ref, w2_ref, b2_ref, o_ref, *,
                     approximate_gelu, gelu_bf16, x_has_seq):
    # Token-0 select: either the wrapper already dropped the seq dim (2-D x_ref)
    # or we read the contiguous (tb, T, D) tile and slice token 0 here.
    if x_has_seq:
        v = x_ref[:, 0, :]
    else:
        v = x_ref[...]
    v = v.astype(jnp.float32)

    # --- LayerNorm over last dim (eps=1e-5, biased variance; affine folded into w1/b1) ---
    mean = jnp.mean(v, axis=-1, keepdims=True)
    var = jnp.mean((v - mean) * (v - mean), axis=-1, keepdims=True)
    xn = (v - mean) * jax.lax.rsqrt(var + 1e-5)

    # --- Linear 1: bf16 operands on the MXU, f32 accumulate, f32 bias ---
    h = jnp.dot(xn.astype(jnp.bfloat16), w1_ref[...],
                preferred_element_type=jnp.float32)
    h = h + b1_ref[...]

    # --- GELU ---
    if approximate_gelu:
        # tanh form -> transcendental runs on the EUP (its own VLIW slot).
        if gelu_bf16:
            # bf16 elementwise halves vreg traffic on v6e/v7x; value is downcast
            # to bf16 for Linear2 anyway so accuracy impact is nil.
            h = h.astype(jnp.bfloat16)
        c = jnp.asarray(0.7978845608028654, h.dtype)   # sqrt(2/pi)
        k = jnp.asarray(0.044715, h.dtype)
        h = 0.5 * h * (1.0 + jnp.tanh(c * (h + k * (h * h * h))))
    else:
        # Exact erf form (nn.GELU default); kept in f32 for parity.
        h = 0.5 * h * (1.0 + jax.lax.erf(h * jnp.float32(0.7071067811865476)))

    # --- Linear 2 on a lane-dense padded [H, 128] weight; slice the 3 real logits ---
    out = jnp.dot(h.astype(jnp.bfloat16), w2_ref[...],
                  preferred_element_type=jnp.float32) + b2_ref[...]   # [tb, 128]
    o_ref[...] = out[:, : o_ref.shape[-1]].astype(o_ref.dtype)


@functools.partial(
    jax.jit,
    static_argnames=("tile_b", "approximate_gelu", "gelu_bf16", "contiguous_x"))
def prob_eval_head(x, gamma, beta, w1, b1, w2, b2, *,
                   tile_b=4096, approximate_gelu=False, gelu_bf16=None,
                   contiguous_x=None):
    """x: [B, T, D] (f32 or bf16). Returns logits [B, 3] (white/draw/black)."""
    B, T, D = x.shape
    H = w1.shape[1]
    n_out = w2.shape[1]          # 3
    n_pad = 128                  # lane-dense padded width for the in-VMEM Linear2
    itemsize = jnp.dtype(x.dtype).itemsize

    if gelu_bf16 is None:
        gelu_bf16 = _has_bf16_vpu()
    if contiguous_x is None:
        # A strided token-0 DMA would read only D*itemsize bytes per
        # T*D*itemsize-strided row; below HBM burst granularity the contiguous
        # stream is as fast or faster and uses far fewer DMA descriptors.
        contiguous_x = (T * D * itemsize) <= 4096

    # Fold the LayerNorm affine into Linear1 (once per call, outside the kernel):
    #   (xn * gamma + beta) @ w1 + b1 == xn @ (gamma[:,None] * w1) + (beta @ w1 + b1)
    w1_f32 = w1.astype(jnp.float32)
    w1f = (gamma.astype(jnp.float32)[:, None] * w1_f32).astype(jnp.bfloat16)
    b1f = (b1.astype(jnp.float32) + beta.astype(jnp.float32) @ w1_f32).reshape(1, H)

    # Zero-pad the tiny [H, 3] projection to [H, 128] for lane-dense MXU compute.
    w2p = (jnp.zeros((H, n_pad), jnp.float32)
           .at[:, :n_out].set(w2.astype(jnp.float32))).astype(jnp.bfloat16)
    b2p = jnp.zeros((1, n_pad), jnp.float32).at[:, :n_out].set(
        b2.astype(jnp.float32).reshape(1, n_out))

    tb = _choose_tile_b(B, tile_b)
    grid = (pl.cdiv(B, tb),)

    if contiguous_x:
        x_in = x
        x_spec = pl.BlockSpec((tb, T, D), lambda i: (i, 0, 0))
        x_row_elems = T * D
    else:
        # Large T: slice token 0 once in XLA; kernel streams a dense [B, D] slab.
        x_in = x[:, 0, :]
        x_spec = pl.BlockSpec((tb, D), lambda i: (i, 0))
        x_row_elems = D

    # Explicit scoped-VMEM budget (covers v5e's 16 MiB default; stays under
    # v7x's 64 MiB physical VMEM for tile_b <= ~8192).
    weight_bytes = (D * H + H * n_pad) * 2 + (H + n_pad) * 4
    work_bytes = tb * (3 * D + 3 * H + 2 * n_pad) * 4      # f32 intermediates
    vmem_limit = int(2 * tb * x_row_elems * itemsize       # double-buffered input
                     + 2 * tb * n_out * 4                  # double-buffered output
                     + 2 * weight_bytes
                     + work_bytes
                     + (4 << 20))
    vmem_limit = max(16 << 20, min(vmem_limit, 64 << 20))

    cost = pl.CostEstimate(
        flops=2 * B * (D * H + H * n_pad),
        transcendentals=B * H,
        bytes_accessed=B * x_row_elems * itemsize + weight_bytes + B * n_out * 4,
    )

    kernel = functools.partial(_evalhead_kernel,
                               approximate_gelu=approximate_gelu,
                               gelu_bf16=gelu_bf16,
                               x_has_seq=contiguous_x)
    return pl.pallas_call(
        kernel,
        out_shape=jax.ShapeDtypeStruct((B, n_out), jnp.float32),
        grid=grid,
        in_specs=[
            x_spec,
            # Weights / biases: constant index_map -> fetched once, VMEM-resident.
            pl.BlockSpec((D, H), lambda i: (0, 0)),        # w1 (gamma folded, bf16)
            pl.BlockSpec((1, H), lambda i: (0, 0)),        # b1 (beta folded, f32)
            pl.BlockSpec((H, n_pad), lambda i: (0, 0)),    # w2 padded (bf16)
            pl.BlockSpec((1, n_pad), lambda i: (0, 0)),    # b2 padded (f32)
        ],
        out_specs=pl.BlockSpec((tb, n_out), lambda i: (i, 0)),
        compiler_params=pltpu.CompilerParams(
            # Batch tiles are independent -> shard across both TCs on v7x.
            dimension_semantics=("parallel",),
            vmem_limit_bytes=vmem_limit,
        ),
        cost_estimate=cost,
    )(x_in, w1f, b1f, w2p, b2p)


def _reference(x, gamma, beta, w1, b1, w2, b2, *, approximate_gelu=False):
    """Pure-JAX reference mirroring the PyTorch module (f32 throughout)."""
    v = x[:, 0].astype(jnp.float32)
    mean = jnp.mean(v, axis=-1, keepdims=True)
    var = jnp.mean((v - mean) ** 2, axis=-1, keepdims=True)
    vn = (v - mean) / jnp.sqrt(var + 1e-5) * gamma + beta
    h = jax.nn.gelu(vn @ w1 + b1, approximate=approximate_gelu)
    return h @ w2 + b2


if __name__ == "__main__":
    # Small config consistent with the module: embed_dim=32, eval_hidden_dim=128.
    B, T, D, H = 2, 8, 32, 128

    key = jax.random.PRNGKey(0)
    kx, kg, kb, kw1, kb1, kw2, kb2, kx2 = jax.random.split(key, 8)

    x = jax.random.normal(kx, (B, T, D), dtype=jnp.float32)
    gamma = 1.0 + 0.05 * jax.random.normal(kg, (D,), dtype=jnp.float32)
    beta = 0.05 * jax.random.normal(kb, (D,), dtype=jnp.float32)
    w1 = jax.random.normal(kw1, (D, H), dtype=jnp.float32) * (1.0 / jnp.sqrt(D))
    b1 = 0.01 * jax.random.normal(kb1, (H,), dtype=jnp.float32)
    w2 = jax.random.normal(kw2, (H, 3), dtype=jnp.float32) * (1.0 / jnp.sqrt(H))
    b2 = 0.01 * jax.random.normal(kb2, (3,), dtype=jnp.float32)

    # 1) Default (exact-erf GELU for nn.GELU parity; contiguous token-0 read).
    out = jax.block_until_ready(prob_eval_head(x, gamma, beta, w1, b1, w2, b2))
    ref = _reference(x, gamma, beta, w1, b1, w2, b2, approximate_gelu=False)
    assert out.shape == (B, 3), out.shape
    assert jnp.allclose(out, ref, atol=5e-2, rtol=5e-2), (out, ref)

    # 2) tanh-GELU path (EUP-friendly; bf16 elementwise on v6e/v7x).
    out_tanh = jax.block_until_ready(
        prob_eval_head(x, gamma, beta, w1, b1, w2, b2, approximate_gelu=True))
    ref_tanh = _reference(x, gamma, beta, w1, b1, w2, b2, approximate_gelu=True)
    assert jnp.allclose(out_tanh, ref_tanh, atol=5e-2, rtol=5e-2), (out_tanh, ref_tanh)

    # 3) Batched path: multiple grid steps + ragged last tile (exercises pipelining
    #    and the >=2-step grid split), plus the wrapper-side token-0 slice path.
    B2 = 100
    x2 = jax.random.normal(kx2, (B2, T, D), dtype=jnp.float32)
    ref2 = _reference(x2, gamma, beta, w1, b1, w2, b2, approximate_gelu=True)
    out2 = jax.block_until_ready(
        prob_eval_head(x2, gamma, beta, w1, b1, w2, b2, tile_b=32,
                       approximate_gelu=True))
    assert out2.shape == (B2, 3), out2.shape
    assert jnp.allclose(out2, ref2, atol=5e-2, rtol=5e-2), (out2, ref2)
    out2b = jax.block_until_ready(
        prob_eval_head(x2, gamma, beta, w1, b1, w2, b2, tile_b=32,
                       approximate_gelu=True, contiguous_x=False))
    assert jnp.allclose(out2b, ref2, atol=5e-2, rtol=5e-2), (out2b, ref2)

    # 4) bf16 activations in -> halves the dominant HBM read; kernel upcasts for LN.
    x_bf16 = x.astype(jnp.bfloat16)
    out_bf = jax.block_until_ready(
        prob_eval_head(x_bf16, gamma, beta, w1, b1, w2, b2))
    ref_bf = _reference(x_bf16.astype(jnp.float32), gamma, beta, w1, b1, w2, b2,
                        approximate_gelu=False)
    assert jnp.allclose(out_bf, ref_bf, atol=1e-1, rtol=1e-1), (out_bf, ref_bf)

    print("KERNEL_OK")
</pallas_src>

<mosaic_0001>
module attributes {stable_mosaic.version = 11 : i64} {
  func.func @_evalhead_kernel(%arg0: i32, %arg1: memref<8x8x32xf32, #tpu.memory_space<vmem>>, %arg2: memref<32x128xbf16, #tpu.memory_space<vmem>>, %arg3: memref<1x128xf32, #tpu.memory_space<vmem>>, %arg4: memref<128x128xbf16, #tpu.memory_space<vmem>>, %arg5: memref<1x128xf32, #tpu.memory_space<vmem>>, %arg6: memref<8x3xf32, #tpu.memory_space<vmem>>) attributes {dimension_semantics = [#tpu.dimension_semantics<parallel>], iteration_bounds = array<i64: 1>, scalar_prefetch = 0 : i64, scratch_operands = 0 : i64, tpu.core_type = #tpu.core_type<tc>, window_params = [{transform_indices = @transform_0, window_bounds = array<i64: 8, 8, 32>}, {pipeline_mode = #tpu.pipeline_mode<synchronous>, transform_indices = @transform_1, window_bounds = array<i64: 32, 128>}, {pipeline_mode = #tpu.pipeline_mode<synchronous>, transform_indices = @transform_2, window_bounds = array<i64: 1, 128>}, {pipeline_mode = #tpu.pipeline_mode<synchronous>, transform_indices = @transform_3, window_bounds = array<i64: 128, 128>}, {pipeline_mode = #tpu.pipeline_mode<synchronous>, transform_indices = @transform_4, window_bounds = array<i64: 1, 128>}, {transform_indices = @transform_5, window_bounds = array<i64: 8, 3>}]} {
    %c0 = arith.constant 0 : index
    %c0_0 = arith.constant 0 : index
    %c0_1 = arith.constant 0 : index
    %0 = vector.load %arg1[%c0, %c0_0, %c0_1] : memref<8x8x32xf32, #tpu.memory_space<vmem>>, vector<8x1x32xf32>
    %1 = vector.shape_cast %0 : vector<8x1x32xf32> to vector<8x32xf32>
    %cst = arith.constant dense<0.000000e+00> : vector<8xf32>
    %2 = vector.multi_reduction <add>, %1, %cst [1] : vector<8x32xf32> to vector<8xf32>
    %3 = vector.shape_cast %2 : vector<8xf32> to vector<8x1xf32>
    %cst_2 = arith.constant 3.200000e+01 : f32
    %4 = vector.broadcast %cst_2 : f32 to vector<8x1xf32>
    %5 = arith.divf %3, %4 : vector<8x1xf32>
    %6 = vector.broadcast %5 : vector<8x1xf32> to vector<8x32xf32>
    %7 = arith.subf %1, %6 : vector<8x32xf32>
    %8 = vector.broadcast %5 : vector<8x1xf32> to vector<8x32xf32>
    %9 = arith.subf %1, %8 : vector<8x32xf32>
    %10 = arith.mulf %7, %9 : vector<8x32xf32>
    %cst_3 = arith.constant dense<0.000000e+00> : vector<8xf32>
    %11 = vector.multi_reduction <add>, %10, %cst_3 [1] : vector<8x32xf32> to vector<8xf32>
    %12 = vector.shape_cast %11 : vector<8xf32> to vector<8x1xf32>
    %cst_4 = arith.constant 3.200000e+01 : f32
    %13 = vector.broadcast %cst_4 : f32 to vector<8x1xf32>
    %14 = arith.divf %12, %13 : vector<8x1xf32>
    %15 = vector.broadcast %5 : vector<8x1xf32> to vector<8x32xf32>
    %16 = arith.subf %1, %15 : vector<8x32xf32>
    %cst_5 = arith.constant 9.99999974E-6 : f32
    %17 = vector.broadcast %cst_5 : f32 to vector<8x1xf32>
    %18 = arith.addf %14, %17 : vector<8x1xf32>
    %19 = math.rsqrt %18 : vector<8x1xf32>
    %20 = vector.broadcast %19 : vector<8x1xf32> to vector<8x32xf32>
    %21 = arith.mulf %16, %20 : vector<8x32xf32>
    %22 = arith.truncf %21 : vector<8x32xf32> to vector<8x32xbf16>
    %c0_6 = arith.constant 0 : index
    %c0_7 = arith.constant 0 : index
    %23 = vector.load %arg2[%c0_6, %c0_7] : memref<32x128xbf16, #tpu.memory_space<vmem>>, vector<32x128xbf16>
    %cst_8 = arith.constant dense<0.000000e+00> : vector<8x128xf32>
    %24 = tpu.matmul %22, %23, %cst_8 {dimension_numbers = #tpu.dot_dimension_numbers<[1], [0], [0], [1], [0, 0, 1, 1], [], []>} : vector<8x32xbf16>, vector<32x128xbf16>, vector<8x128xf32> -> vector<8x128xf32>
    %c0_9 = arith.constant 0 : index
    %c0_10 = arith.constant 0 : index
    %25 = vector.load %arg3[%c0_9, %c0_10] : memref<1x128xf32, #tpu.memory_space<vmem>>, vector<1x128xf32>
    %26 = vector.broadcast %25 : vector<1x128xf32> to vector<8x128xf32>
    %27 = arith.addf %24, %26 : vector<8x128xf32>
    %cst_11 = arith.constant 5.000000e-01 : f32
    %28 = vector.broadcast %cst_11 : f32 to vector<8x128xf32>
    %29 = arith.mulf %28, %27 : vector<8x128xf32>
    %cst_12 = arith.constant 0.707106769 : f32
    %30 = vector.broadcast %cst_12 : f32 to vector<8x128xf32>
    %31 = arith.mulf %27, %30 : vector<8x128xf32>
    %32 = math.erf %31 : vector<8x128xf32>
    %cst_13 = arith.constant 1.000000e+00 : f32
    %33 = vector.broadcast %cst_13 : f32 to vector<8x128xf32>
    %34 = arith.addf %33, %32 : vector<8x128xf32>
    %35 = arith.mulf %29, %34 : vector<8x128xf32>
    %36 = arith.truncf %35 : vector<8x128xf32> to vector<8x128xbf16>
    %c0_14 = arith.constant 0 : index
    %c0_15 = arith.constant 0 : index
    %37 = vector.load %arg4[%c0_14, %c0_15] : memref<128x128xbf16, #tpu.memory_space<vmem>>, vector<128x128xbf16>
    %cst_16 = arith.constant dense<0.000000e+00> : vector<8x128xf32>
    %38 = tpu.matmul %36, %37, %cst_16 {dimension_numbers = #tpu.dot_dimension_numbers<[1], [0], [0], [1], [0, 0, 1, 1], [], []>} : vector<8x128xbf16>, vector<128x128xbf16>, vector<8x128xf32> -> vector<8x128xf32>
    %c0_17 = arith.constant 0 : index
    %c0_18 = arith.constant 0 : index
    %39 = vector.load %arg5[%c0_17, %c0_18] : memref<1x128xf32, #tpu.memory_space<vmem>>, vector<1x128xf32>
    %40 = vector.broadcast %39 : vector<1x128xf32> to vector<8x128xf32>
    %41 = arith.addf %38, %40 : vector<8x128xf32>
    %42 = vector.extract_strided_slice %41 {offsets = [0, 0], sizes = [8, 3], strides = [1, 1]} : vector<8x128xf32> to vector<8x3xf32>
    %c0_19 = arith.constant 0 : index
    %c0_20 = arith.constant 0 : index
    %43 = vector.load %arg6[%c0_19, %c0_20] : memref<8x3xf32, #tpu.memory_space<vmem>>, vector<8x3xf32>
    tpu.vector_store %arg6[%c0_19, %c0_20], %42 {strides = array<i32>} : memref<8x3xf32, #tpu.memory_space<vmem>>, vector<8x3xf32>,
    return
  }
  func.func @transform_0(%arg0: i32) -> (i32, i32, i32) {
    %c0_i32 = arith.constant 0 : i32
    %c0_i32_0 = arith.constant 0 : i32
    %c0_i32_1 = arith.constant 0 : i32
    return %arg0, %c0_i32, %c0_i32_0 : i32, i32, i32
  }
  func.func @transform_1(%arg0: i32) -> (i32, i32) {
    %c0_i32 = arith.constant 0 : i32
    %c0_i32_0 = arith.constant 0 : i32
    %c0_i32_1 = arith.constant 0 : i32
    return %c0_i32, %c0_i32_0 : i32, i32
  }
  func.func @transform_2(%arg0: i32) -> (i32, i32) {
    %c0_i32 = arith.constant 0 : i32
    %c0_i32_0 = arith.constant 0 : i32
    %c0_i32_1 = arith.constant 0 : i32
    return %c0_i32, %c0_i32_0 : i32, i32
  }
  func.func @transform_3(%arg0: i32) -> (i32, i32) {
    %c0_i32 = arith.constant 0 : i32
    %c0_i32_0 = arith.constant 0 : i32
    %c0_i32_1 = arith.constant 0 : i32
    return %c0_i32, %c0_i32_0 : i32, i32
  }
  func.func @transform_4(%arg0: i32) -> (i32, i32) {
    %c0_i32 = arith.constant 0 : i32
    %c0_i32_0 = arith.constant 0 : i32
    %c0_i32_1 = arith.constant 0 : i32
    return %c0_i32, %c0_i32_0 : i32, i32
  }
  func.func @transform_5(%arg0: i32) -> (i32, i32) {
    %c0_i32 = arith.constant 0 : i32
    %c0_i32_0 = arith.constant 0 : i32
    return %arg0, %c0_i32 : i32, i32
  }
}

</mosaic_0001>

<bundles_post_ra>
// kernel: prob_eval_head.1
= control target key start
LH: loop header
LB: loop body
LE: loop exit
PB: predicated region body
PF: predicated region fallthrough
CT: control target
= control target key end

     0   :  { %vm39_vm0 = vcmask 1041409   ;;  %vm42_vm1 = vcmask 1042434   ;;  %vm45_vm2 = vcmask 1043459   ;;  %s670_s0 = inlined_call_operand.vmem [shape: f32[2,8,32], index: 0, kind: input, shape index: {}]   ;;  %s671_s1 = inlined_call_operand.vmem [shape: bf16[32,128], index: 1, kind: input, shape index: {}]   ;;  %s672_s2 = inlined_call_operand.vmem [shape: f32[1,128], index: 2, kind: input, shape index: {}]   ;;  %s673_s3 = inlined_call_operand.vmem [shape: bf16[128,128], index: 3, kind: input, shape index: {}]   ;;  %s674_s4 = inlined_call_operand.vmem [shape: f32[1,128], index: 4, kind: input, shape index: {}]   ;;  %s675_s5 = inlined_call_operand.hbm [shape: f32[2,3], index: 5, kind: output, shape index: {}]  }
   0x1   :  { %v22_v0 = vld [vmem:[%s670_s0] sm:$0x1]  ;;  %v23_v1 = vld [vmem:[%s670_s0 + $0x8] sm:$0x1]  ;;  %v24_v2 = vld [vmem:[%s670_s0 + $0x10] sm:$0x1] }
   0x2   :  { %v25_v3 = vld [vmem:[%s670_s0 + $0x18] sm:$0x1]  ;;  %v26_v4 = vld [vmem:[%s670_s0 + $0x20] sm:$0x1]  ;;  %v27_v5 = vld [vmem:[%s670_s0 + $0x28] sm:$0x1] }
   0x3   :  { %v28_v6 = vld [vmem:[%s670_s0 + $0x30] sm:$0x1]  ;;  %v29_v7 = vld [vmem:[%s670_s0 + $0x38] sm:$0x1]  ;;  %v38_v8 = vrot.slane %v23_v1, 7  ;;  %v41_v9 = vrot.slane %v24_v2, 6 }
   0x4   :  { %v44_v10 = vrot.slane %v25_v3, 5 }
   0x5   :  { %10 = vsyncpa [#allocation3], 0  ;;  %v40_v11 = vsel %vm39_vm0, %v38_v8, %v22_v0  ;;  %v47_v12 = vrot.slane %v26_v4, 4  ;;  %vm48_vm3 = vcmask 1044484   ;;  %v50_v13 = vrot.slane %v27_v5, 3  ;;  %v449_v63 = vld [vmem:[%s671_s1] sm:$0xff]  }
   0x6   :  { %v43_v14 = vsel %vm42_vm1, %v41_v9, %v40_v11  ;;  %vm51_vm4 = vcmask 1045509   ;;  %v53_v15 = vrot.slane %v28_v6, 2  ;;  %vm54_vm5 = vcmask 1046534  }
   0x7   :  { %v46_v16 = vsel %vm45_vm2, %v44_v10, %v43_v14  ;;  %v56_v17 = vrot.slane %v29_v7, 1  ;;  %vm57_vm6 = vcmask 1047559   ;;  %vm60_vm7 = vcmask 261120  }
   0x8   :  { %v49_v18 = vsel %vm48_vm3, %v47_v12, %v46_v16  ;;  %vm488_vm8 = vmmov 0   ;;  %vm373_vm9 = vcmask 23552  }
   0x9   :  { %v52_v19 = vsel %vm51_vm4, %v50_v13, %v49_v18 }
   0xa   :  { %v55_v20 = vsel %vm54_vm5, %v53_v15, %v52_v19 }
   0xb   :  { %v58_v21 = vsel %vm57_vm6, %v56_v17, %v55_v20 }
   0xc   :  { %v61_v22 = vsel %vm60_vm7, %v58_v21, 0.0 }
   0xd   :  { %62 = vadd.xlane.f32.xlu0 %v61_v22 }
  0x9a   :  { %v63_v23 = vpop.xlane.xlu0 %62 }
  0x9b   :  { %v65_v24 = vmul.f32 0.03125, %v63_v23 }
  0x9d   :  { %v67_v25 = vrot.slane %v65_v24, 1  ;;  %v68_v26 = vrot.slane %v65_v24, 2  ;;  %v69_v27 = vrot.slane %v65_v24, 3  ;;  %v70_v28 = vrot.slane %v65_v24, 4 }
  0x9e   :  { %v71_v29 = vrot.slane %v65_v24, 5  ;;  %v72_v30 = vrot.slane %v65_v24, 6  ;;  %v73_v31 = vrot.slane %v65_v24, 7  ;;  %v554_v32 = vsub.f32 %v22_v0, %v65_v24 }
  0x9f   :  { %v556_v33 = vsub.f32 %v23_v1, %v67_v25  ;;  %v558_v34 = vsub.f32 %v24_v2, %v68_v26  ;;  %v560_v35 = vsub.f32 %v25_v3, %v69_v27  ;;  %v562_v36 = vsub.f32 %v26_v4, %v70_v28  ;;  %v450_v1 = vld [vmem:[%s671_s1 + $0x8] sm:$0xff]   ;;  %v451_v2 = vld [vmem:[%s673_s3] sm:$0xff]   ;;  %v453_v4 = vld [vmem:[%s673_s3 + $0x10] sm:$0xff]  }
  0xa0   :  { %v564_v37 = vsub.f32 %v27_v5, %v71_v29  ;;  %v566_v38 = vsub.f32 %v28_v6, %v72_v30  ;;  %v568_v39 = vsub.f32 %v29_v7, %v73_v31  ;;  %v90_v44 = vmul.f32 %v554_v32, %v554_v32  ;;  %v452_v3 = vld [vmem:[%s673_s3 + $0x8] sm:$0xff]  }
  0xa1   :  { %v91_v40 = vmul.f32 %v556_v33, %v556_v33  ;;  %v92_v41 = vmul.f32 %v558_v34, %v558_v34  ;;  %v93_v42 = vmul.f32 %v560_v35, %v560_v35  ;;  %v94_v43 = vmul.f32 %v562_v36, %v562_v36 }
  0xa2   :  { %v95_v45 = vmul.f32 %v564_v37, %v564_v37  ;;  %v96_v48 = vmul.f32 %v566_v38, %v566_v38  ;;  %v97_v49 = vmul.f32 %v568_v39, %v568_v39  ;;  %v487_v0 = vmov 0.0  }
  0xa3   :  { %v106_v46 = vrot.slane %v91_v40, 7  ;;  %v108_v47 = vrot.slane %v92_v41, 6  ;;  %v110_v51 = vrot.slane %v93_v42, 5  ;;  %v112_v53 = vrot.slane %v94_v43, 4  ;;  %416 = vmatprep.subr.bf16.mxu0 %v487_v0  ;;  %420 = vmatprep.mubr.msk.bf16.mxu0 %vm488_vm8, %v487_v0 }
  0xa4   :  { %v114_v55 = vrot.slane %v95_v45, 3  ;;  %v116_v57 = vrot.slane %v96_v48, 2  ;;  %v118_v59 = vrot.slane %v97_v49, 1  ;;  %417 = vmatpush3.bf16.msra.mxu0 %v449_v63  ;;  %424 = vmatprep.subr.bf16.mxu1 %v487_v0 }
  0xa5   :  { %v107_v50 = vsel %vm39_vm0, %v106_v46, %v90_v44  ;;  %418 = vmatprep.subr.bf16.mxu0 %v487_v0  ;;  %440 = vmatprep.mubr.msk.bf16.mxu1 %vm488_vm8, %v487_v0 }
  0xa6   :  { %v109_v52 = vsel %vm42_vm1, %v108_v47, %v107_v50  ;;  %425 = vmatpush3.bf16.msra.mxu1 %v451_v2 }
  0xa7   :  { %v111_v54 = vsel %vm45_vm2, %v110_v51, %v109_v52  ;;  %426 = vmatprep.subr.bf16.mxu1 %v487_v0 }
  0xa8   :  { %v113_v56 = vsel %vm48_vm3, %v112_v53, %v111_v54  ;;  %419 = vmatpush3.bf16.msra.mxu0 %v450_v1 }
  0xa9   :  { %v115_v58 = vsel %vm51_vm4, %v114_v55, %v113_v56  ;;  %v454_v55 = vld [vmem:[%s673_s3 + $0x18] sm:$0xff]   ;;  %v455_v56 = vld [vmem:[%s673_s3 + $0x20] sm:$0xff]  }
  0xaa   :  { %v117_v60 = vsel %vm54_vm5, %v116_v57, %v115_v58  ;;  %427 = vmatpush3.bf16.msra.mxu1 %v452_v3  ;;  %v456_v57 = vld [vmem:[%s673_s3 + $0x28] sm:$0xff]   ;;  %v457_v58 = vld [vmem:[%s673_s3 + $0x30] sm:$0xff]  }
  0xab   :  { %v119_v61 = vsel %vm57_vm6, %v118_v59, %v117_v60  ;;  %428 = vmatprep.subr.bf16.mxu1 %v487_v0  ;;  %v458_v59 = vld [vmem:[%s673_s3 + $0x38] sm:$0xff]   ;;  %v391_v60 = vld [vmem:[%s672_s2] ss:$0 sm:$0xff] }
  0xac   :  { %v121_v62 = vsel %vm60_vm7, %v119_v61, 0.0 }
  0xad   :  { %122 = vadd.xlane.f32.xlu0 %v121_v62 }
  0xae   :  { %429 = vmatpush3.bf16.msra.mxu1 %v453_v4 }
  0xaf   :  { %430 = vmatprep.subr.bf16.mxu1 %v487_v0 }
  0xb2   :  { %431 = vmatpush3.bf16.msra.mxu1 %v454_v55 }
  0xb3   :  { %432 = vmatprep.subr.bf16.mxu1 %v487_v0 }
  0xb6   :  { %433 = vmatpush3.bf16.msra.mxu1 %v455_v56 }
  0xb7   :  { %434 = vmatprep.subr.bf16.mxu1 %v487_v0 }
  0xba   :  { %435 = vmatpush3.bf16.msra.mxu1 %v456_v57 }
  0xbb   :  { %436 = vmatprep.subr.bf16.mxu1 %v487_v0 }
  0xbe   :  { %437 = vmatpush3.bf16.msra.mxu1 %v457_v58 }
  0xbf   :  { %438 = vmatprep.subr.bf16.mxu1 %v487_v0  ;;  %v395_v0 = vld [vmem:[%s674_s4] ss:$0 sm:$0xff] }
  0xc2   :  { %439 = vmatpush3.bf16.msra.mxu1 %v458_v59 }
 0x13a   :  { %v123_v5 = vpop.xlane.xlu0 %122 }
 0x13b   :  { %v124_v6 = vmul.f32 0.03125, %v123_v5 }
 0x13d   :  { %v125_v7 = vadd.f32 1e-05, %v124_v6 }
 0x13f   :  { %459 = vrsqrt.f32 %v125_v7 }
 0x149   :  { %v460_v8 = vpop.eup %459 }
 0x14a   :  { %v128_v9 = vrot.slane %v460_v8, 1  ;;  %v129_v10 = vrot.slane %v460_v8, 2  ;;  %v130_v11 = vrot.slane %v460_v8, 3  ;;  %v131_v12 = vrot.slane %v460_v8, 4 }
 0x14b   :  { %v132_v13 = vrot.slane %v460_v8, 5  ;;  %v133_v14 = vrot.slane %v460_v8, 6  ;;  %v134_v15 = vrot.slane %v460_v8, 7  ;;  %v143_v16 = vmul.f32 %v460_v8, %v554_v32 }
 0x14c   :  { %v144_v17 = vmul.f32 %v128_v9, %v556_v33  ;;  %v145_v18 = vmul.f32 %v129_v10, %v558_v34  ;;  %v146_v19 = vmul.f32 %v130_v11, %v560_v35  ;;  %v147_v20 = vmul.f32 %v131_v12, %v562_v36 }
 0x14d   :  { %v148_v21 = vmul.f32 %v132_v13, %v564_v37  ;;  %v149_v22 = vmul.f32 %v133_v14, %v566_v38  ;;  %v150_v23 = vmul.f32 %v134_v15, %v568_v39  ;;  %v151_v24 = vpack.c.bf16 %v143_v16, %v143_v16 }
 0x14e   :  { %v152_v25 = vpack.c.bf16 %v144_v17, %v144_v17  ;;  %v153_v26 = vpack.c.bf16 %v145_v18, %v145_v18  ;;  %v154_v27 = vpack.c.bf16 %v146_v19, %v146_v19  ;;  %v155_v28 = vpack.c.bf16 %v147_v20, %v147_v20 }
 0x14f   :  { %v156_v29 = vpack.c.bf16 %v148_v21, %v148_v21  ;;  %v157_v30 = vpack.c.bf16 %v149_v22, %v149_v22  ;;  %v158_v31 = vpack.c.bf16 %v150_v23, %v150_v23  ;;  %v178_v40 = vunpack.c.l.b16 %v151_v24 }
 0x150   :  { %v179_v32 = vunpack.c.l.b16 %v152_v25  ;;  %v180_v33 = vunpack.c.l.b16 %v153_v26  ;;  %v181_v34 = vunpack.c.l.b16 %v154_v27  ;;  %v182_v35 = vunpack.c.l.b16 %v155_v28 }
 0x151   :  { %v183_v36 = vunpack.c.l.b16 %v156_v29  ;;  %v184_v42 = vunpack.c.l.b16 %v157_v30  ;;  %v185_v38 = vunpack.c.l.b16 %v158_v31 }
 0x152   :  { %v186_v41 = vrot.slane %v179_v32, 7  ;;  %v188_v37 = vrot.slane %v180_v33, 6  ;;  %v190_v43 = vrot.slane %v181_v34, 5  ;;  %v192_v45 = vrot.slane %v182_v35, 4 }
 0x153   :  { %v194_v47 = vrot.slane %v183_v36, 3  ;;  %v196_v49 = vrot.slane %v184_v42, 2  ;;  %v198_v51 = vrot.slane %v185_v38, 1 }
 0x154   :  { %v187_v39 = vsel %vm39_vm0, %v186_v41, %v178_v40 }
 0x155   :  { %v189_v44 = vsel %vm42_vm1, %v188_v37, %v187_v39 }
 0x156   :  { %v191_v46 = vsel %vm45_vm2, %v190_v43, %v189_v44 }
 0x157   :  { %v193_v48 = vsel %vm48_vm3, %v192_v45, %v191_v46 }
 0x158   :  { %v195_v50 = vsel %vm51_vm4, %v194_v47, %v193_v48 }
 0x159   :  { %v197_v52 = vsel %vm54_vm5, %v196_v49, %v195_v50 }
 0x15a   :  { %v199_v53 = vsel %vm57_vm6, %v198_v51, %v197_v52 }
 0x15b   :  { %v200_v54 = vpack.c.b16 %v199_v53, %v199_v53 }
 0x15d   :  { %421 = vmatmul.mubr.msk.bf16.vlgmr.msra.gmra.mrb[0].mxu0 %vm60_vm7, %v200_v54 }
 0x230   :  { %v250_v61 = vpop.f32.mrb[0].mxu0 }
 0x231   :  { %v251_v62 = vadd.f32 %v391_v60, %v250_v61  ;;  %v422_v63 = vpop.f32.mrb[1].mxu0 }
 0x232   :  { %v253_v1 = vpop.f32.mrb[2].mxu0 }
 0x233   :  { %v257_v2 = vmul.f32 0.70710677, %v251_v62  ;;  %v423_v3 = vpop.f32.mrb[3].mxu0  ;;  %v256_v5 = vmul.f32 0.5, %v251_v62 }
 0x235   :  { %461 = verf.f32 %v257_v2 }
 0x23f   :  { %v462_v4 = vpop.eup %461 }
 0x240   :  { %v259_v6 = vadd.f32 1.0, %v462_v4 }
 0x242   :  { %v260_v7 = vmul.f32 %v259_v6, %v256_v5 }
 0x244   :  { %v261_v8 = vpack.c.bf16 %v260_v7, %v260_v7 }
 0x246   :  { %441 = vmatmul.mubr.bf16.vlgmr.msra.gmra.mrb[0].mxu1 %v261_v8 }
 0x319   :  { %v367_v9 = vpop.f32.mrb[0].mxu1 }
 0x31a   :  { %v368_v10 = vadd.f32 %v395_v0, %v367_v9  ;;  %v442_v11 = vpop.f32.mrb[1].mxu1 }
 0x31b   :  { %v370_v12 = vpop.f32.mrb[2].mxu1 }
 0x31c   :  { %374 = vst.msk [vmem:[#allocation2] sm:$0xff] %vm373_vm9, %v368_v10  ;;  %v443_v13 = vpop.f32.mrb[3].mxu1 }
 0x31d   :  { %379 = vsyncadd [#allocation3], 96  ;;  %s489_s2 = smov [#allocation2]  }
 0x31e   :  { %s380_s30 = sshll.u32 %s489_s2, 4  ;;  %s381_s30 = int_to_ptr.vmem [resolvable:$true] %s380_s30 }
 0x31f   :  { %s463_s6 = scalar_lea.vmem %s381_s30, 32  ;;  %s467_s7 = scalar_lea.vmem %s381_s30, 128 }
 0x320   :  { %p464_p0 = scmp.ne.s32.totalorder %s381_s30, %s463_s6  ;;  %p468_p1 = scmp.lt.s32.totalorder %s381_s30, %s381_s30 }
 0x321   :  { %p469_p2 = scmp.lt.s32.totalorder %s467_s7, %s463_s6 }
 0x323   :  { %p470_p3 = por %p469_p2, %p468_p1 }
 0x325   :  { %p471_p4 = pnand %p470_p3, %p464_p0 }
 0x327   :  { %474 = shalt.err (!%p471_p4)
}
 0x328   :  { %s475_s0 = scalar_lea.hbm %s675_s5, 32 }
 0x329   :  { %p476_p5 = scmp.ne.s32.totalorder %s675_s5, %s475_s0  ;;  %p479_p6 = scmp.lt.u32.totalorder %s475_s0, %s675_s5 }
 0x32b   :  { %p481_p7 = pnand %p479_p6, %p476_p5 }
 0x32d   :  { %484 = shalt.err (!%p481_p7)
}
 0x32e   :  { %s490_s13 = smov 32   ;;  %s491_s14 = smov 2  }
 0x32f   :  { %386 = dma.vmem_to_hbm [thread:$0]  %s381_s30, 32, %s675_s5, [#allocation3], %s490_s13, %s490_s13, %s491_s14  }
 0x330   :  { %485 = dma.done.wait [#allocation3], 128  }
 0x331   :  { %486 = vsyncadd [#allocation3], 4294967168 }
 0x332   :  { %390 = vsyncpa [#allocation3], 1 }

</bundles_post_ra>
